<compile_context>
chip_gen: v6e
topology: v6e:2x2x1
jax: 0.10.0
libtpu: 0.0.40
codegen_flags: <defaults>
</compile_context>

<pallas_src>
import math

import jax
import jax.numpy as jnp
from jax import lax
from jax.experimental import pallas as pl
from jax.experimental.pallas import tpu as pltpu


_PALLAS_MIN_BYTES = 2 * 1024 * 1024     # below this, XLA's fused emitter beats launch/step overhead
_PALLAS_MIN_BATCH = 256                 # need >= 2 lane/sublane-aligned tiles for a useful grid
_TARGET_TILE_BYTES = 4 * 1024 * 1024    # ~4 MiB padded x tile -> HBM-roofline regime on v5e/v6e/v7x


def _round_up(x, m):
    return ((x + m - 1) // m) * m


def _round_down(x, m):
    return (x // m) * m


def _sublane_multiple(dtype):
    # native sublane packing: 8 rows for 32-bit, 16 for 16-bit, 32 for 8-bit dtypes
    return max(8, 32 // max(jnp.dtype(dtype).itemsize, 1))


def _matvec_kernel(x_ref, w_ref, b_ref, o_ref):
    """output_dim == 1, lane-dense: (1, D) x (tm, D) --contract D--> (1, tm)."""
    s = lax.dot_general(
        w_ref[...], x_ref[...],
        dimension_numbers=(((1,), (1,)), ((), ())),
        preferred_element_type=jnp.float32,
    )                                                   # (1, tm): batch rows on lanes
    o_ref[...] = (s + b_ref[0]).astype(o_ref.dtype)     # bias is an SMEM scalar


def _matmul_kernel(x_ref, w_ref, b_ref, o_ref):
    """output_dim > 1: MXU matmul with f32 accumulation + lane-broadcast bias."""
    acc = jnp.dot(x_ref[...], w_ref[...], preferred_element_type=jnp.float32)
    o_ref[...] = (acc + b_ref[...].astype(jnp.float32)).astype(o_ref.dtype)


def _pick_tile_rows(B, D, O, dtype):
    """Byte-based tile sizing (padded), capped so the batch grid has >= 2 steps."""
    itemsize = jnp.dtype(dtype).itemsize
    sub = _sublane_multiple(dtype)
    # For O == 1 the tile row count becomes the output LANE dim -> keep it a multiple of
    # 128 (unmasked vst); otherwise the dtype's native sublane multiple is enough.
    mult = 128 if O == 1 else sub
    row_bytes = _round_up(D, 128) * itemsize                      # padded VMEM bytes per x row
    tm = max(mult, _round_down(_TARGET_TILE_BYTES // row_bytes, mult))
    # keep >= 2 grid steps so the "parallel" batch axis can shard across both v7x TCs
    tm = min(tm, max(mult, _round_down(B // 2, mult)))
    # never request a block taller than the (tile-aligned) batch
    tm = min(tm, max(mult, _round_down(B, mult)))
    return int(tm)


def _vmem_ceiling_bytes():
    try:
        capacity = int(pltpu.get_tpu_info().vmem_capacity_bytes)
    except Exception:
        capacity = 64 * 1024 * 1024       # conservative (v7x-sized) fallback
    return capacity // 2                  # ~32 MiB on v7x, ~64 MiB on v5e/v6e


def _linear_pallas(x, weight, bias):
    """Tiled Pallas linear: x[B,D] @ weight[O,D].T + bias[O].

    Returns [B] when O == 1 (already squeezed), else [B, O].
    """
    B, D = x.shape
    O = weight.shape[0]
    dtype = x.dtype
    itemsize = jnp.dtype(dtype).itemsize
    sub = _sublane_multiple(dtype)
    tm = _pick_tile_rows(B, D, O, dtype)
    num_tiles = pl.cdiv(B, tm)
    grid = (num_tiles,)

    d_pad = _round_up(D, 128)
    x_spec = pl.BlockSpec((tm, D), lambda i: (i, 0))
    x_tile_bytes = _round_up(tm, sub) * d_pad * itemsize          # (8,128)-padded VMEM bytes

    if O == 1:
        kernel = _matvec_kernel
        w_arg = weight.reshape(1, D)                              # PyTorch weight row
        b_arg = bias.reshape(1)
        w_spec = pl.BlockSpec((1, D), lambda i: (0, 0))           # resident across the grid
        b_spec = pl.BlockSpec(memory_space=pltpu.MemorySpace.SMEM)
        out_shape = jax.ShapeDtypeStruct((1, num_tiles * tm), dtype)   # lane-dense output row
        out_spec = pl.BlockSpec((1, tm), lambda i: (0, i))
        out_tile_bytes = 8 * tm * itemsize                        # (1,tm) pads to (8,tm)
        w_bytes = 8 * d_pad * itemsize
        b_bytes = 0                                               # SMEM scalar
        hbm_w_bytes = D * itemsize
    else:
        kernel = _matmul_kernel
        o_pad = _round_up(O, 128)
        w_arg = weight.T                                          # (D, O) so kernel does x @ W^T
        b_arg = bias.reshape(1, O)
        w_spec = pl.BlockSpec((D, O), lambda i: (0, 0))           # resident across the grid
        b_spec = pl.BlockSpec((1, O), lambda i: (0, 0))
        out_shape = jax.ShapeDtypeStruct((B, O), dtype)
        out_spec = pl.BlockSpec((tm, O), lambda i: (i, 0))
        out_tile_bytes = tm * o_pad * itemsize                    # lane-padded out tile
        w_bytes = _round_up(D, sub) * o_pad * itemsize
        b_bytes = 8 * o_pad * itemsize
        hbm_w_bytes = D * O * itemsize

    # VMEM budget from PADDED tile sizes: double-buffered x/out + resident weight/bias
    # + headroom for matmul/transpose temps and Mosaic internal scratch.
    need = 2 * (x_tile_bytes + out_tile_bytes) + 2 * (w_bytes + b_bytes)
    need += x_tile_bytes + out_tile_bytes + (4 << 20)
    vmem_bytes = int(min(max(need, 16 << 20), _vmem_ceiling_bytes()))

    cost = pl.CostEstimate(
        flops=2 * B * D * O,
        transcendentals=0,
        bytes_accessed=B * D * itemsize + hbm_w_bytes + O * itemsize + B * O * itemsize,
    )

    out = pl.pallas_call(
        kernel,
        out_shape=out_shape,
        grid_spec=pltpu.PrefetchScalarGridSpec(
            num_scalar_prefetch=0,
            grid=grid,
            in_specs=[x_spec, w_spec, b_spec],
            out_specs=out_spec,
        ),
        compiler_params=pltpu.CompilerParams(
            dimension_semantics=("parallel",),
            vmem_limit_bytes=vmem_bytes,
        ),
        cost_estimate=cost,
    )(x, w_arg, b_arg)

    if O == 1:
        # drop the (num_tiles*tm - B) garbage lanes written by the partial last tile
        return out[0, :B]
    return out


def regression_head_forward(x, weight, bias, *, force_pallas=False):
    """Pallas equivalent of RegressionHead.forward (default nn.Linear model).

    x      : [B, input_dim]
    weight : [output_dim, input_dim]   (PyTorch nn.Linear layout)
    bias   : [output_dim]
    returns: output.squeeze(-1) semantics -> [B] if output_dim == 1 else [B, output_dim]
    """
    B, D = x.shape
    O = weight.shape[0]
    total_bytes = B * D * jnp.dtype(x.dtype).itemsize
    use_pallas = force_pallas or (total_bytes >= _PALLAS_MIN_BYTES and B >= _PALLAS_MIN_BATCH)
    if use_pallas:
        return _linear_pallas(x, weight, bias)        # already [B] when O == 1
    # Tiny problem: pallas_call launch + per-step overhead dominates; let XLA fuse it.
    out = x @ weight.T + bias
    return jnp.squeeze(out, axis=-1) if O == 1 else out


# TODO(synk): custom_nn injection and the MSELoss-based .loss() method are config/training
# features outside the forward pass and are not translated here.


if __name__ == "__main__":
    key = jax.random.PRNGKey(0)
    k_x1, k_x2, k_x3, k_x4, k_w1, k_b1, k_w4, k_b4 = jax.random.split(key, 8)

    def init_linear(kw, kb, in_dim, out_dim):
        bound = 1.0 / math.sqrt(in_dim)
        w = jax.random.uniform(kw, (out_dim, in_dim), minval=-bound, maxval=bound,
                               dtype=jnp.float32)
        b = jax.random.uniform(kb, (out_dim,), minval=-bound, maxval=bound,
                               dtype=jnp.float32)
        return w, b

    input_dim = 32

    # 1) module-default tiny shape (batch=8, output_dim=1) -> XLA fallback path.
    w1, b1 = init_linear(k_w1, k_b1, input_dim, 1)
    x1 = jax.random.normal(k_x1, (8, input_dim), dtype=jnp.float32)
    out1 = jax.block_until_ready(regression_head_forward(x1, w1, b1))
    ref1 = jnp.squeeze(x1 @ w1.T + b1, axis=-1)
    assert out1.shape == (8,), out1.shape
    assert jnp.allclose(out1, ref1, atol=1e-5, rtol=1e-5)

    # 2) small forced-Pallas run (batch=256) -> lane-dense matvec kernel, grid of 2 tiles.
    x2 = jax.random.normal(k_x2, (256, input_dim), dtype=jnp.float32)
    out2 = jax.block_until_ready(regression_head_forward(x2, w1, b1, force_pallas=True))
    ref2 = jnp.squeeze(x2 @ w1.T + b1, axis=-1)
    assert out2.shape == (256,), out2.shape
    assert jnp.allclose(out2, ref2, atol=1e-4, rtol=1e-4)

    # 3) large ragged batch (output_dim=1) -> Pallas matvec; partial last tile sliced off.
    x3 = jax.random.normal(k_x3, (16684, input_dim), dtype=jnp.float32)
    out3 = jax.block_until_ready(regression_head_forward(x3, w1, b1))
    ref3 = jnp.squeeze(x3 @ w1.T + b1, axis=-1)
    assert out3.shape == (16684,), out3.shape
    assert jnp.allclose(out3, ref3, atol=1e-4, rtol=1e-4)

    # 4) output_dim > 1 (ragged batch) -> Pallas MXU kernel (squeeze(-1) is a no-op).
    output_dim4 = 4
    w4, b4 = init_linear(k_w4, k_b4, input_dim, output_dim4)
    x4 = jax.random.normal(k_x4, (16500, input_dim), dtype=jnp.float32)
    out4 = jax.block_until_ready(regression_head_forward(x4, w4, b4))
    ref4 = x4 @ w4.T + b4
    assert out4.shape == (16500, output_dim4), out4.shape
    assert jnp.allclose(out4, ref4, atol=1e-4, rtol=1e-4)

    print("KERNEL_OK")
</pallas_src>

<mosaic_0001>
module attributes {stable_mosaic.version = 11 : i64} {
  func.func @_matvec_kernel(%arg0: i32, %arg1: memref<128x32xf32, #tpu.memory_space<vmem>>, %arg2: memref<1x32xf32, #tpu.memory_space<vmem>>, %arg3: memref<1xf32, #tpu.memory_space<smem>>, %arg4: memref<1x128xf32, #tpu.memory_space<vmem>>) attributes {dimension_semantics = [#tpu.dimension_semantics<parallel>], iteration_bounds = array<i64: 2>, scalar_prefetch = 0 : i64, scratch_operands = 0 : i64, tpu.core_type = #tpu.core_type<tc>, window_params = [{transform_indices = @transform_0, window_bounds = array<i64: 128, 32>}, {pipeline_mode = #tpu.pipeline_mode<synchronous>, transform_indices = @transform_1, window_bounds = array<i64: 1, 32>}, {transform_indices = @transform_2, window_bounds = array<i64: 1>}, {transform_indices = @transform_3, window_bounds = array<i64: 1, 128>}]} {
    %c0 = arith.constant 0 : index
    %c0_0 = arith.constant 0 : index
    %0 = vector.load %arg2[%c0, %c0_0] : memref<1x32xf32, #tpu.memory_space<vmem>>, vector<1x32xf32>
    %c0_1 = arith.constant 0 : index
    %c0_2 = arith.constant 0 : index
    %1 = vector.load %arg1[%c0_1, %c0_2] : memref<128x32xf32, #tpu.memory_space<vmem>>, vector<128x32xf32>
    %cst = arith.constant dense<0.000000e+00> : vector<1x128xf32>
    %2 = tpu.matmul %0, %1, %cst {dimension_numbers = #tpu.dot_dimension_numbers<[1], [1], [0], [0], [0, 0, 1, 0], [], []>} : vector<1x32xf32>, vector<128x32xf32>, vector<1x128xf32> -> vector<1x128xf32>
    %c0_3 = arith.constant 0 : index
    %3 = memref.load %arg3[%c0_3] : memref<1xf32, #tpu.memory_space<smem>>
    %4 = vector.broadcast %3 : f32 to vector<1x128xf32>
    %5 = arith.addf %2, %4 : vector<1x128xf32>
    %c0_4 = arith.constant 0 : index
    %c0_5 = arith.constant 0 : index
    %6 = vector.load %arg4[%c0_4, %c0_5] : memref<1x128xf32, #tpu.memory_space<vmem>>, vector<1x128xf32>
    tpu.vector_store %arg4[%c0_4, %c0_5], %5 {strides = array<i32>} : memref<1x128xf32, #tpu.memory_space<vmem>>, vector<1x128xf32>,
    return
  }
  func.func @transform_0(%arg0: i32) -> (i32, i32) {
    %c0_i32 = arith.constant 0 : i32
    %c0_i32_0 = arith.constant 0 : i32
    return %arg0, %c0_i32 : i32, i32
  }
  func.func @transform_1(%arg0: i32) -> (i32, i32) {
    %c0_i32 = arith.constant 0 : i32
    %c0_i32_0 = arith.constant 0 : i32
    %c0_i32_1 = arith.constant 0 : i32
    return %c0_i32, %c0_i32_0 : i32, i32
  }
  func.func @transform_2(%arg0: i32) -> i32 {
    %c0_i32 = arith.constant 0 : i32
    %c0_i32_0 = arith.constant 0 : i32
    return %c0_i32 : i32
  }
  func.func @transform_3(%arg0: i32) -> (i32, i32) {
    %c0_i32 = arith.constant 0 : i32
    %c0_i32_0 = arith.constant 0 : i32
    return %c0_i32, %arg0 : i32, i32
  }
}

</mosaic_0001>

<bundles_post_ra>
// kernel: tpu_custom_call.1
= control target key start
LH: loop header
LB: loop body
LE: loop exit
PB: predicated region body
PF: predicated region fallthrough
CT: control target
= control target key end

     0   :  { %s718_s0 = inlined_call_operand.vmem [shape: f32[256,32], index: 0, kind: input, shape index: {}]   ;;  %s719_s1 = inlined_call_operand.vmem [shape: f32[1,32], index: 1, kind: input, shape index: {}]   ;;  %s720_s2 = inlined_call_operand.<no memory space> [shape: f32[1], index: 2, kind: input, shape index: {}]   ;;  %s721_s3 = inlined_call_operand.hbm [shape: f32[1,256], index: 3, kind: output, shape index: {}]  }
   0x1   :  { %8 = sst [smem:[#allocation2]] %s720_s2 }
   0x2   :  { %9 = vsyncpa [#allocation4], 0 }
   0x3   :  { %11 = vsyncpa [#allocation4 + $0x1], 0  ;;  %s588_s14 = smov 0   ;;  %s590_s15 = smov 0  }
   0x4   :  { %s592_s16 = smov 0   ;;  %s594_s17 = smov 0  }
   0x5 LB: > { %s380_s2 = sadd.s32 4294967295, %s560_s17   ;;  %s381_s18 = sadd.s32 4294967294, %s560_s17   ;;  %s560_s17 = sphi %s594_s17, %s727_s17   ;;  %s556_s16 = sphi %s592_s16, %s726_s16   ;;  %s552_s15 = sphi %s590_s15, %s725_s15   ;;  %s548_s14 = sphi %s588_s14, %s724_s14  }
   0x6   : > { %s611_s19 = sadd.s32 1, %s560_s17   ;;  %s92_s20 = sadd.s32 1, %s556_s16 }
   0x7   : > { %s89_s21 = ssub.s32 %s560_s17, %s611_s19  ;;  %p102_p0 = scmp.ne.s32.totalorder %s556_s16, %s552_s15 }
   0x8   : > { %p90_p1 = scmp.eq.s32.totalorder %s89_s21, 0  ;;  %p103_p2 = scmp.eq.s32.totalorder %s380_s2, 1 }
   0x9   : > { %p108_p3 = scmp.ne.s32.totalorder %s552_s15, %s548_s14  ;;  %p109_p4 = scmp.eq.s32.totalorder %s381_s18, 1 }
   0xa   : > { %s621_s22 = scalar_select %p90_p1, %s556_s16, %s92_s20  }
   0xb   : > { %p623_p5 = por %p103_p2, %p102_p0  ;;  %p627_p6 = por %p109_p4, %p108_p3 }
   0xc   : > { %p384_p7 = scmp.ge.s32.totalorder %s560_s17, 1  ;;  %p142_p8 = scmp.lt.s32.totalorder %s560_s17, 3 }
   0xe   : > { %p143_p9 = pnand %p384_p7, %p142_p8 }
   0xf   : > { %s633_s25 = sshll.u32 (!%p143_p9), %s380_s2, 4  ;;  %s188_s6 = sld [smem:[#allocation2]] (!%p143_p9) }
  0x10   : > { %146 = sbr.rel (%p143_p9) target bundleno = 297 (0x129), region = 32  ;;  %p166_p10 = scmp.lt.s32.totalorder (!%p143_p9), %s633_s25, 31 }
  0x11   : > { %s163_s7 = sand.u32 (!%p143_p9), 1, %s552_s15   ;;  %s683_s12 = scalar_lea.hbm (!%p143_p9), %s721_s3, %s633_s25 }
  0x12   : > { %s164_s8 = scalar_lea.vmem (!%p143_p9), [#allocation3], %s163_s7  ;;  %s314_s13 = scalar_lea.sflag (!%p143_p9), [#allocation4], %s163_s7 }
  0x13   : > { %s326_s9 = sshll.u32 (!%p143_p9), %s164_s8, 4  ;;  %s564_s18 = smov (!%p143_p9), [#allocation3]   ;;  %s327_s9 = int_to_ptr.vmem [resolvable:$true] %s326_s9 }
  0x14   : > { %s500_s2 = scalar_lea.vmem (!%p143_p9), %s327_s9, 16  ;;  %s504_s20 = sshll.u32 (!%p143_p9), %s564_s18, 4  ;;  %s505_s20 = int_to_ptr.vmem [resolvable:$false] %s504_s20 }
  0x15   : > { %v562_v0 = vmov 0.0   ;;  %vm563_vm0 = vmmov 0   ;;  %s167_s26 = scalar_select %p166_p10, %s633_s25, 31  ;;  %vm190_vm1 = vcmask 261120   ;;  %v171_v17 = vld [vmem:[%s719_s1] sm:$0x1]  ;;  %v189_v18 = vstv %s188_s6 }
  0x16   : > { %424 = vmatprep.subr.mxu0 %v562_v0  ;;  %456 = vmatprep.mubr.msk.f32.mxu0 %vm563_vm0, %v562_v0  ;;  %p501_p11 = scmp.ne.s32.totalorder %s327_s9, %s500_s2  ;;  %s506_s21 = scalar_lea.vmem %s505_s20, 32 }
  0x17   : > { %s386_s27 = sshll.u32 %s167_s26, 3  ;;  %p507_p0 = scmp.lt.s32.totalorder %s327_s9, %s505_s20 }
  0x18   : > { %s640_s30 = scalar_lea.vmem %s718_s0, %s386_s27  ;;  %p502_p12 = pnand %p501_p11, %p623_p5 }
  0x19   : > { %v187_v1 = vld [vmem:[%s640_s30 + $0x78] sm:$0xff]  ;;  %v186_v2 = vld [vmem:[%s640_s30 + $0x70] sm:$0xff]  ;;  %v185_v3 = vld [vmem:[%s640_s30 + $0x68] sm:$0xff]  ;;  %p508_p1 = scmp.lt.s32.totalorder %s506_s21, %s500_s2 }
  0x1a   : > { %425 = vmatpush3.xpose.msk.msra.mxu0 %vm190_vm1, %v187_v1  ;;  %v184_v4 = vld [vmem:[%s640_s30 + $0x60] sm:$0xff]  ;;  %v183_v5 = vld [vmem:[%s640_s30 + $0x58] sm:$0xff]  ;;  %v182_v6 = vld [vmem:[%s640_s30 + $0x50] sm:$0xff]  ;;  %p503_p13 = pneg %p502_p12 }
  0x1b   : > { %426 = vmatprep.subr.mxu0 %v562_v0  ;;  %v181_v7 = vld [vmem:[%s640_s30 + $0x48] sm:$0xff]  ;;  %v180_v8 = vld [vmem:[%s640_s30 + $0x40] sm:$0xff]  ;;  %v179_v9 = vld [vmem:[%s640_s30 + $0x38] sm:$0xff]  ;;  %p509_p2 = por %p508_p1, %p507_p0 }
  0x1c   : > { %v178_v10 = vld [vmem:[%s640_s30 + $0x30] sm:$0xff]  ;;  %v177_v11 = vld [vmem:[%s640_s30 + $0x28] sm:$0xff]  ;;  %v176_v12 = vld [vmem:[%s640_s30 + $0x20] sm:$0xff] }
  0x1d   : > { %v175_v13 = vld [vmem:[%s640_s30 + $0x18] sm:$0xff]  ;;  %v174_v14 = vld [vmem:[%s640_s30 + $0x10] sm:$0xff]  ;;  %v173_v15 = vld [vmem:[%s640_s30 + $0x8] sm:$0xff]  ;;  %p510_p3 = pnand %p509_p2, %p503_p13 }
  0x1e   : > { %427 = vmatpush3.xpose.msk.msra.mxu0 %vm190_vm1, %v186_v2  ;;  %v172_v16 = vld [vmem:[%s640_s30] sm:$0xff] }
  0x1f   : > { %428 = vmatprep.subr.mxu0 %v562_v0 }
  0x22   : > { %429 = vmatpush3.xpose.msk.msra.mxu0 %vm190_vm1, %v185_v3 }
  0x23   : > { %430 = vmatprep.subr.mxu0 %v562_v0 }
  0x26   : > { %431 = vmatpush3.xpose.msk.msra.mxu0 %vm190_vm1, %v184_v4 }
  0x27   : > { %432 = vmatprep.subr.mxu0 %v562_v0 }
  0x2a   : > { %433 = vmatpush3.xpose.msk.msra.mxu0 %vm190_vm1, %v183_v5 }
  0x2b   : > { %434 = vmatprep.subr.mxu0 %v562_v0 }
  0x2e   : > { %435 = vmatpush3.xpose.msk.msra.mxu0 %vm190_vm1, %v182_v6 }
  0x2f   : > { %436 = vmatprep.subr.mxu0 %v562_v0 }
  0x32   : > { %437 = vmatpush3.xpose.msk.msra.mxu0 %vm190_vm1, %v181_v7 }
  0x33   : > { %438 = vmatprep.subr.mxu0 %v562_v0 }
  0x36   : > { %439 = vmatpush3.xpose.msk.msra.mxu0 %vm190_vm1, %v180_v8 }
  0x37   : > { %440 = vmatprep.subr.mxu0 %v562_v0 }
  0x3a   : > { %441 = vmatpush3.xpose.msk.msra.mxu0 %vm190_vm1, %v179_v9 }
  0x3b   : > { %442 = vmatprep.subr.mxu0 %v562_v0 }
  0x3e   : > { %443 = vmatpush3.xpose.msk.msra.mxu0 %vm190_vm1, %v178_v10 }
  0x3f   : > { %444 = vmatprep.subr.mxu0 %v562_v0 }
  0x42   : > { %445 = vmatpush3.xpose.msk.msra.mxu0 %vm190_vm1, %v177_v11 }
  0x43   : > { %446 = vmatprep.subr.mxu0 %v562_v0 }
  0x46   : > { %447 = vmatpush3.xpose.msk.msra.mxu0 %vm190_vm1, %v176_v12 }
  0x47   : > { %448 = vmatprep.subr.mxu0 %v562_v0 }
  0x4a   : > { %449 = vmatpush3.xpose.msk.msra.mxu0 %vm190_vm1, %v175_v13 }
  0x4b   : > { %450 = vmatprep.subr.mxu0 %v562_v0 }
  0x4e   : > { %451 = vmatpush3.xpose.msk.msra.mxu0 %vm190_vm1, %v174_v14 }
  0x4f   : > { %452 = vmatprep.subr.mxu0 %v562_v0 }
  0x52   : > { %453 = vmatpush3.xpose.msk.msra.mxu0 %vm190_vm1, %v173_v15 }
  0x53   : > { %454 = vmatprep.subr.mxu0 %v562_v0 }
  0x56   : > { %455 = vmatpush3.xpose.msk.msra.mxu0 %vm190_vm1, %v172_v16 }
  0x59   : > { %457 = vmatmul.mubr.msk.f32.vlgmr.msra.gmra.mxu0 %vm190_vm1, %v171_v17 }
 0x119   : > { %v308_v19 = vpop.f32.mrf.mxu0 }
 0x11a   : > { %v309_v20 = vadd.f32 %v308_v19, %v189_v18 }
 0x11b   : > { %v458_v21 = vpop.f32.mrf.mxu0 }
 0x11c   : > { %312 = vst [vmem:[%s164_s8] sm:$0x1] %v309_v20 }
 0x11d   : > { %513 = shalt.err (!%p510_p3)
}
 0x11e   : > { %s514_s25 = scalar_lea.hbm %s683_s12, 16  ;;  %s518_s28 = scalar_lea.hbm %s721_s3, 32 }
 0x11f   : > { %p515_p4 = scmp.ne.s32.totalorder %s683_s12, %s514_s25  ;;  %p519_p9 = scmp.lt.s32.totalorder %s683_s12, %s721_s3 }
 0x120   : > { %p520_p10 = scmp.lt.s32.totalorder %s518_s28, %s514_s25 }
 0x121   : > { %p516_p7 = pnand %p515_p4, %p623_p5 }
 0x122   : > { %p521_p11 = por %p520_p10, %p519_p9 }
 0x123   : > { %p517_p8 = pneg %p516_p7 }
 0x125   : > { %p522_p12 = pnand %p521_p11, %p517_p8 }
 0x127   : > { %525 = shalt.err (!%p522_p12)
}
 0x128   : > { %459 = dma.vmem_to_hbm [thread:$0]  (%p623_p5), %s327_s9, 16, %s683_s12, %s314_s13  }
 0x129 PF: > { %p465_p13 = scmp.ge.s32.totalorder %s560_s17, 2  ;;  %s338_s4 = sand.u32 1, %s548_s14  }
 0x12a   : > { %s339_s5 = scalar_lea.sflag [#allocation4], %s338_s4 }
 0x12b   : > { %p462_p0 = pnand %p465_p13, %p627_p6 }
 0x12d   : > { %p463_p1 = pneg %p462_p0 }
 0x12f   : > { %543 = dma.done.wait (%p463_p1), %s339_s5, 16  }
 0x130   : > { %545 = vsyncadd (%p463_p1), %s339_s5, 4294967280  ;;  %p14_p2 = scmp.ge.s32.totalorder %s611_s19, 4   ;;  %s724_s14 = smov %s552_s15 }
 0x131   : > { %s725_s15 = smov %s556_s16  ;;  %s726_s16 = smov %s621_s22 }
 0x132   : > { %s727_s17 = smov %s611_s19  ;;  %16 = sbr.rel (!%p14_p2) target bundleno = 5 (0x5), region = 67 }
 0x137   :  { %343 = vsyncpa [#allocation4], 1 }
 0x138   :  { %345 = vsyncpa [#allocation4 + $0x1], 1 }

</bundles_post_ra>
